<compile_context>
chip_gen: v5e
topology: v5e:2x2
jax: 0.10.0
libtpu: 0.0.40
codegen_flags: <defaults>
</compile_context>

<pallas_src>
import functools

import jax
import jax.numpy as jnp
from jax import lax
from jax.experimental import pallas as pl
from jax.experimental.pallas import tpu as pltpu


def _gumbel_vq_kernel(x_ref, noise_ref, w_ref, b_ref, mask_ref, cb_ref,
                      code_ref, counts_ref, *, num_groups, inv_temperature):
    """One grid step = one (batch, token-tile) block.

    x_ref     : (1, E, tn)  f32   input features (channel-major, per batch)
    noise_ref : (1, tn, GV) f32   pre-sampled Gumbel noise
    w_ref     : (E, GV)     bf16  projection weight (resident)
    b_ref     : (1, GV)     f32   projection bias (resident)
    mask_ref  : (G, GV)     f32   per-group additive mask, 0 / -inf (resident)
    cb_ref    : (GV, Gd)    bf16  block-diagonal codebook (resident)
    code_ref  : (1, tn, Gd) bf16  selected code vectors
    counts_ref: (1, 1, 8, GV) f32 per-tile codeword usage counts (8 replicated rows)
    """
    G = num_groups
    _, E, tn = x_ref.shape
    GV = w_ref.shape[1]

    # ---- projection: hs = x_tile^T @ W  (token-major transpose folded into the
    # MXU contraction; bf16 operands, f32 accumulation).
    x_t = x_ref[0].astype(jnp.bfloat16)                          # (E, tn)
    hs = lax.dot_general(
        x_t, w_ref[...],
        dimension_numbers=(((0,), (0,)), ((), ())),
        preferred_element_type=jnp.float32)                       # (tn, GV)

    # logits + bias + gumbel noise, scaled by 1/tau (all f32 element-wise).
    s = (hs + b_ref[...] + noise_ref[0]) * jnp.float32(inv_temperature)

    # ---- hard gumbel-softmax: per-group one-hot of the argmax.
    # One lane-reduce (max) + one compare per group; masking is a single vadd
    # against a resident 0/-inf mask row.  Ties are measure-zero with
    # continuous Gumbel noise, so the explicit first-index tie-break was
    # dropped (review item: halves the XLU reduce count).
    mask = mask_ref[...]                                          # (G, GV)
    onehot = jnp.zeros((tn, GV), jnp.float32)
    for g in range(G):
        s_g = s + mask[g]                                         # -inf outside group
        m_g = jnp.max(s_g, axis=-1, keepdims=True)                # (tn, 1)
        onehot = onehot + (s_g == m_g).astype(jnp.float32)

    onehot_bf = onehot.astype(jnp.bfloat16)                       # 0/1 exact in bf16

    # ---- codebook selection: one MXU matmul against the (GV, Gd) block-diagonal
    # codebook; selected rows are exact bf16 values, so the bf16 store is lossless.
    code = jnp.dot(onehot_bf, cb_ref[...], preferred_element_type=jnp.float32)
    code_ref[0] = code.astype(code_ref.dtype)                     # (tn, Gd) bf16

    # ---- per-tile codeword usage counts on the MXU (keeps the XLU free):
    # ones(8, tn) @ onehot -> (8, GV), already in the replicated output shape.
    ones8 = jnp.ones((8, tn), jnp.bfloat16)
    counts_ref[0, 0] = jnp.dot(ones8, onehot_bf,
                               preferred_element_type=jnp.float32)


def gumbel_vector_quantizer(x, w, b, codebook, *, num_groups, num_vectors,
                            temperature, noise=None, rng_seed=0,
                            token_tile=None):
    """Forward pass of GumbelVectorQuantizer.

    x        : (B, C, H, W) float32, C == extracted_feature_size
    w, b     : nn.Linear params, shapes (G*V, C) and (G*V,)
    codebook : (1, G, V, C // G)
    noise    : optional pre-sampled Gumbel noise (B, H*W, G*V).  If None it is
               sampled here with jax.random (seeded by rng_seed).
    Returns (code_vector (B, H*W, C) bf16, entropy scalar f32).
    """
    B, C, H, W = x.shape
    N = H * W
    E = C
    G, V = num_groups, num_vectors
    d = E // G
    GV, Gd = G * V, G * d

    if token_tile is None:
        token_tile = next((t for t in (2048, 1024, 512, 256, 128) if N % t == 0), N)
    tn = token_tile
    assert N % tn == 0, "token_tile must divide H*W"
    T = N // tn
    # NOTE: for best performance E, GV, Gd should be multiples of 128 (lane-dense
    # blocks); correctness does not depend on it since those dims are unblocked.
    # On v7x, keep B*T >= 2 (and even) so both TensorCores get work.

    if noise is None:
        # TODO(synk): replace with on-chip pltpu.prng_* sampling once the target
        # guarantees Mosaic lowering (interpret/CPU has no rule for prng_seed).
        noise = jax.random.gumbel(jax.random.PRNGKey(rng_seed), (B, N, GV),
                                  jnp.float32)
    noise = noise.astype(jnp.float32)

    # Glue (cheap / one-off): x fed as (B, C, N) — a free reshape; the transpose
    # happens inside the kernel on the MXU path.
    x_cn = x.reshape(B, C, N).astype(jnp.float32)
    w_t = jnp.transpose(w).astype(jnp.bfloat16)                   # (E, GV), resident
    b2 = b.reshape(1, GV).astype(jnp.float32)
    cb = codebook.reshape(G, V, d).astype(jnp.bfloat16)
    # block-diagonal (GV, Gd) codebook built with a single einsum (no scatter loop).
    bd = jnp.einsum("gvj,gh->gvhj", cb,
                    jnp.eye(G, dtype=cb.dtype)).reshape(GV, Gd)
    # per-group additive mask: 0 inside the group's V columns, -inf elsewhere.
    col_grp = jnp.arange(GV, dtype=jnp.int32) // V                # (GV,)
    mask = jnp.where(col_grp[None, :] == jnp.arange(G, dtype=jnp.int32)[:, None],
                     jnp.float32(0.0), -jnp.inf).astype(jnp.float32)  # (G, GV)

    kernel = functools.partial(_gumbel_vq_kernel, num_groups=G,
                               inv_temperature=1.0 / float(temperature))

    vmem_limit = (40 if tn >= 1024 else 32) * 1024 * 1024

    code, counts = pl.pallas_call(
        kernel,
        out_shape=(jax.ShapeDtypeStruct((B, N, Gd), jnp.bfloat16),
                   jax.ShapeDtypeStruct((B, T, 8, GV), jnp.float32)),
        grid=(B, T),
        in_specs=[
            pl.BlockSpec((1, E, tn), lambda bi, ti: (bi, 0, ti)),   # x (streamed)
            pl.BlockSpec((1, tn, GV), lambda bi, ti: (bi, ti, 0)),  # noise (streamed)
            pl.BlockSpec((E, GV), lambda bi, ti: (0, 0)),           # W (resident)
            pl.BlockSpec((1, GV), lambda bi, ti: (0, 0)),           # bias (resident)
            pl.BlockSpec((G, GV), lambda bi, ti: (0, 0)),           # group mask (resident)
            pl.BlockSpec((GV, Gd), lambda bi, ti: (0, 0)),          # codebook (resident)
        ],
        out_specs=[
            pl.BlockSpec((1, tn, Gd), lambda bi, ti: (bi, ti, 0)),
            pl.BlockSpec((1, 1, 8, GV), lambda bi, ti: (bi, ti, 0, 0)),
        ],
        compiler_params=pltpu.CompilerParams(
            dimension_semantics=("parallel", "parallel"),
            vmem_limit_bytes=vmem_limit),
    )(x_cn, noise, w_t, b2, mask, bd)

    # Tiny reduction in plain JAX: per-(batch, group) softmax over codeword usage
    # counts, then the entropy scalar (matches the PyTorch forward).
    counts_bg = jnp.sum(counts[:, :, 0, :], axis=1).reshape(B, G, V)
    p = jax.nn.softmax(counts_bg, axis=-1)
    entropy = -jnp.sum(p * jnp.log(p + 1e-8)) / (G * V)
    return code, entropy


def _reference(x, w, b, codebook, noise, G, V, tau):
    """Pure-JAX reference mirroring the PyTorch forward (same noise, same bf16
    operand rounding as the kernel)."""
    B, C, H, W = x.shape
    N = H * W
    d = C // G
    x_tok = jnp.transpose(x.reshape(B, C, N), (0, 2, 1))
    hs = jnp.dot(x_tok.astype(jnp.bfloat16), jnp.transpose(w).astype(jnp.bfloat16),
                 preferred_element_type=jnp.float32) + b
    s = ((hs + noise) / tau).reshape(B, N, G, V)
    idx = jnp.argmax(s, axis=-1)
    onehot = jax.nn.one_hot(idx, V, dtype=jnp.float32)            # (B, N, G, V)
    cb = codebook.reshape(1, 1, G, V, d).astype(jnp.bfloat16).astype(jnp.float32)
    code = jnp.sum(onehot[..., None] * cb, axis=3).reshape(B, N, G * d)
    counts = jnp.sum(onehot, axis=1)                              # (B, G, V)
    p = jax.nn.softmax(counts, axis=-1)
    ent = -jnp.sum(p * jnp.log(p + 1e-8)) / (G * V)
    return code, ent


if __name__ == "__main__":
    # Small, module-consistent, lane-dense shapes (E = GV = Gd = 128).
    B, C, H, W = 2, 128, 16, 16        # extracted_feature_size = 128, N = 256 tokens
    G, V = 2, 64                       # num_groups, num_vectors
    TAU = 0.5
    N, E = H * W, C
    d = E // G

    key = jax.random.PRNGKey(0)
    kx, kw, kb, kc, kn = jax.random.split(key, 5)
    x = jax.random.normal(kx, (B, C, H, W), jnp.float32)
    w = jax.random.normal(kw, (G * V, E), jnp.float32) * 0.1      # nn.Linear weight (out, in)
    bias = jax.random.normal(kb, (G * V,), jnp.float32) * 0.1     # nn.Linear bias
    codebook = jax.random.normal(kc, (1, G, V, d), jnp.float32)
    gumbel = jax.random.gumbel(kn, (B, N, G * V), jnp.float32)

    code_ref, ent_ref = _reference(x, w, bias, codebook, gumbel, G, V, TAU)

    # 1) explicit small tile (token_tile=128 -> grid (2, 2)) with shared noise,
    #    validated against the pure-JAX reference.
    code, ent = gumbel_vector_quantizer(
        x, w, bias, codebook, num_groups=G, num_vectors=V,
        temperature=TAU, noise=gumbel, token_tile=128)
    jax.block_until_ready((code, ent))
    assert code.shape == (B, N, E) and code.dtype == jnp.bfloat16
    assert jnp.allclose(code.astype(jnp.float32), code_ref, atol=1e-4, rtol=1e-4), \
        "code mismatch"
    assert jnp.allclose(ent, ent_ref, atol=1e-5, rtol=1e-5), "entropy mismatch"

    # 2) default tile (256 -> one token tile per batch) with wrapper-sampled noise;
    #    structural checks: every (token, group) slice must be exactly one
    #    (bf16-rounded) codebook row of that group, entropy must be finite.
    code2, ent2 = gumbel_vector_quantizer(
        x, w, bias, codebook, num_groups=G, num_vectors=V,
        temperature=TAU, rng_seed=1234)
    jax.block_until_ready((code2, ent2))
    cb_q = codebook.reshape(G, V, d).astype(jnp.bfloat16).astype(jnp.float32)
    code2_f = code2.astype(jnp.float32)
    diff = jnp.abs(code2_f.reshape(B, N, G, 1, d) - cb_q[None, None])
    nearest = jnp.min(jnp.max(diff, axis=-1), axis=-1)            # (B, N, G)
    assert float(jnp.max(nearest)) < 1e-4, "sampled code rows not from the codebook"
    assert bool(jnp.isfinite(ent2)), "entropy not finite"

    print("KERNEL_OK")
</pallas_src>

<mosaic_0001>
module attributes {stable_mosaic.version = 11 : i64} {
  func.func @_gumbel_vq_kernel(%arg0: i32, %arg1: i32, %arg2: memref<1x128x128xf32, #tpu.memory_space<vmem>>, %arg3: memref<1x128x128xf32, #tpu.memory_space<vmem>>, %arg4: memref<128x128xbf16, #tpu.memory_space<vmem>>, %arg5: memref<1x128xf32, #tpu.memory_space<vmem>>, %arg6: memref<2x128xf32, #tpu.memory_space<vmem>>, %arg7: memref<128x128xbf16, #tpu.memory_space<vmem>>, %arg8: memref<1x128x128xbf16, #tpu.memory_space<vmem>>, %arg9: memref<1x1x8x128xf32, #tpu.memory_space<vmem>>) attributes {dimension_semantics = [#tpu.dimension_semantics<parallel>, #tpu.dimension_semantics<parallel>], iteration_bounds = array<i64: 2, 2>, scalar_prefetch = 0 : i64, scratch_operands = 0 : i64, tpu.core_type = #tpu.core_type<tc>, window_params = [{transform_indices = @transform_0, window_bounds = array<i64: 1, 128, 128>}, {transform_indices = @transform_1, window_bounds = array<i64: 1, 128, 128>}, {pipeline_mode = #tpu.pipeline_mode<synchronous>, transform_indices = @transform_2, window_bounds = array<i64: 128, 128>}, {pipeline_mode = #tpu.pipeline_mode<synchronous>, transform_indices = @transform_3, window_bounds = array<i64: 1, 128>}, {pipeline_mode = #tpu.pipeline_mode<synchronous>, transform_indices = @transform_4, window_bounds = array<i64: 2, 128>}, {pipeline_mode = #tpu.pipeline_mode<synchronous>, transform_indices = @transform_5, window_bounds = array<i64: 128, 128>}, {transform_indices = @transform_6, window_bounds = array<i64: 1, 128, 128>}, {transform_indices = @transform_7, window_bounds = array<i64: 1, 1, 8, 128>}]} {
    %c0 = arith.constant 0 : index
    %c0_0 = arith.constant 0 : index
    %c0_1 = arith.constant 0 : index
    %0 = vector.load %arg2[%c0, %c0_0, %c0_1] : memref<1x128x128xf32, #tpu.memory_space<vmem>>, vector<1x128x128xf32>
    %1 = vector.shape_cast %0 : vector<1x128x128xf32> to vector<128x128xf32>
    %2 = arith.truncf %1 : vector<128x128xf32> to vector<128x128xbf16>
    %c0_2 = arith.constant 0 : index
    %c0_3 = arith.constant 0 : index
    %3 = vector.load %arg4[%c0_2, %c0_3] : memref<128x128xbf16, #tpu.memory_space<vmem>>, vector<128x128xbf16>
    %cst = arith.constant dense<0.000000e+00> : vector<128x128xf32>
    %4 = tpu.matmul %2, %3, %cst {dimension_numbers = #tpu.dot_dimension_numbers<[0], [0], [1], [1], [0, 1, 1, 1], [], []>} : vector<128x128xbf16>, vector<128x128xbf16>, vector<128x128xf32> -> vector<128x128xf32>
    %c0_4 = arith.constant 0 : index
    %c0_5 = arith.constant 0 : index
    %5 = vector.load %arg5[%c0_4, %c0_5] : memref<1x128xf32, #tpu.memory_space<vmem>>, vector<1x128xf32>
    %6 = vector.broadcast %5 : vector<1x128xf32> to vector<128x128xf32>
    %7 = arith.addf %4, %6 : vector<128x128xf32>
    %c0_6 = arith.constant 0 : index
    %c0_7 = arith.constant 0 : index
    %c0_8 = arith.constant 0 : index
    %8 = vector.load %arg3[%c0_6, %c0_7, %c0_8] : memref<1x128x128xf32, #tpu.memory_space<vmem>>, vector<1x128x128xf32>
    %9 = vector.shape_cast %8 : vector<1x128x128xf32> to vector<128x128xf32>
    %10 = arith.addf %7, %9 : vector<128x128xf32>
    %cst_9 = arith.constant 2.000000e+00 : f32
    %11 = vector.broadcast %cst_9 : f32 to vector<128x128xf32>
    %12 = arith.mulf %10, %11 : vector<128x128xf32>
    %c0_10 = arith.constant 0 : index
    %c0_11 = arith.constant 0 : index
    %13 = vector.load %arg6[%c0_10, %c0_11] : memref<2x128xf32, #tpu.memory_space<vmem>>, vector<2x128xf32>
    %cst_12 = arith.constant 0.000000e+00 : f32
    %14 = vector.broadcast %cst_12 : f32 to vector<128x128xf32>
    %15 = vector.extract_strided_slice %13 {offsets = [0, 0], sizes = [1, 128], strides = [1, 1]} : vector<2x128xf32> to vector<1x128xf32>
    %16 = vector.shape_cast %15 : vector<1x128xf32> to vector<128xf32>
    %17 = vector.shape_cast %16 : vector<128xf32> to vector<1x128xf32>
    %18 = vector.broadcast %17 : vector<1x128xf32> to vector<128x128xf32>
    %19 = arith.addf %12, %18 : vector<128x128xf32>
    %cst_13 = arith.constant dense<0xFF800000> : vector<128xf32>
    %20 = vector.multi_reduction <maximumf>, %19, %cst_13 [1] : vector<128x128xf32> to vector<128xf32>
    %21 = vector.shape_cast %20 : vector<128xf32> to vector<128x1xf32>
    %22 = vector.broadcast %21 : vector<128x1xf32> to vector<128x128xf32>
    %23 = arith.cmpf oeq, %19, %22 : vector<128x128xf32>
    %24 = arith.extui %23 : vector<128x128xi1> to vector<128x128xi32>
    %25 = arith.sitofp %24 : vector<128x128xi32> to vector<128x128xf32>
    %26 = arith.addf %14, %25 : vector<128x128xf32>
    %27 = vector.extract_strided_slice %13 {offsets = [1, 0], sizes = [1, 128], strides = [1, 1]} : vector<2x128xf32> to vector<1x128xf32>
    %28 = vector.shape_cast %27 : vector<1x128xf32> to vector<128xf32>
    %29 = vector.shape_cast %28 : vector<128xf32> to vector<1x128xf32>
    %30 = vector.broadcast %29 : vector<1x128xf32> to vector<128x128xf32>
    %31 = arith.addf %12, %30 : vector<128x128xf32>
    %cst_14 = arith.constant dense<0xFF800000> : vector<128xf32>
    %32 = vector.multi_reduction <maximumf>, %31, %cst_14 [1] : vector<128x128xf32> to vector<128xf32>
    %33 = vector.shape_cast %32 : vector<128xf32> to vector<128x1xf32>
    %34 = vector.broadcast %33 : vector<128x1xf32> to vector<128x128xf32>
    %35 = arith.cmpf oeq, %31, %34 : vector<128x128xf32>
    %36 = arith.extui %35 : vector<128x128xi1> to vector<128x128xi32>
    %37 = arith.sitofp %36 : vector<128x128xi32> to vector<128x128xf32>
    %38 = arith.addf %26, %37 : vector<128x128xf32>
    %39 = arith.truncf %38 : vector<128x128xf32> to vector<128x128xbf16>
    %c0_15 = arith.constant 0 : index
    %c0_16 = arith.constant 0 : index
    %40 = vector.load %arg7[%c0_15, %c0_16] : memref<128x128xbf16, #tpu.memory_space<vmem>>, vector<128x128xbf16>
    %cst_17 = arith.constant dense<0.000000e+00> : vector<128x128xf32>
    %41 = tpu.matmul %39, %40, %cst_17 {dimension_numbers = #tpu.dot_dimension_numbers<[1], [0], [0], [1], [0, 0, 1, 1], [], []>} : vector<128x128xbf16>, vector<128x128xbf16>, vector<128x128xf32> -> vector<128x128xf32>
    %42 = arith.truncf %41 : vector<128x128xf32> to vector<128x128xbf16>
    %c0_18 = arith.constant 0 : index
    %c0_19 = arith.constant 0 : index
    %c0_20 = arith.constant 0 : index
    %43 = vector.load %arg8[%c0_18, %c0_19, %c0_20] : memref<1x128x128xbf16, #tpu.memory_space<vmem>>, vector<1x128x128xbf16>
    %44 = vector.shape_cast %43 : vector<1x128x128xbf16> to vector<128x128xbf16>
    %45 = vector.shape_cast %42 : vector<128x128xbf16> to vector<1x128x128xbf16>
    tpu.vector_store %arg8[%c0_18, %c0_19, %c0_20], %45 {strides = array<i32>} : memref<1x128x128xbf16, #tpu.memory_space<vmem>>, vector<1x128x128xbf16>,
    %cst_21 = arith.constant 1.000000e+00 : bf16
    %46 = vector.broadcast %cst_21 : bf16 to vector<8x128xbf16>
    %cst_22 = arith.constant dense<0.000000e+00> : vector<8x128xf32>
    %47 = tpu.matmul %46, %39, %cst_22 {dimension_numbers = #tpu.dot_dimension_numbers<[1], [0], [0], [1], [0, 0, 1, 1], [], []>} : vector<8x128xbf16>, vector<128x128xbf16>, vector<8x128xf32> -> vector<8x128xf32>
    %c0_23 = arith.constant 0 : index
    %c0_24 = arith.constant 0 : index
    %c0_25 = arith.constant 0 : index
    %c0_26 = arith.constant 0 : index
    %48 = vector.load %arg9[%c0_23, %c0_24, %c0_25, %c0_26] : memref<1x1x8x128xf32, #tpu.memory_space<vmem>>, vector<1x1x8x128xf32>
    %49 = vector.shape_cast %48 : vector<1x1x8x128xf32> to vector<8x128xf32>
    %50 = vector.shape_cast %47 : vector<8x128xf32> to vector<1x1x8x128xf32>
    tpu.vector_store %arg9[%c0_23, %c0_24, %c0_25, %c0_26], %50 {strides = array<i32>} : memref<1x1x8x128xf32, #tpu.memory_space<vmem>>, vector<1x1x8x128xf32>,
    return
  }
  func.func @transform_0(%arg0: i32, %arg1: i32) -> (i32, i32, i32) {
    %c0_i32 = arith.constant 0 : i32
    %c0_i32_0 = arith.constant 0 : i32
    return %arg0, %c0_i32, %arg1 : i32, i32, i32
  }
  func.func @transform_1(%arg0: i32, %arg1: i32) -> (i32, i32, i32) {
    %c0_i32 = arith.constant 0 : i32
    %c0_i32_0 = arith.constant 0 : i32
    return %arg0, %arg1, %c0_i32 : i32, i32, i32
  }
  func.func @transform_2(%arg0: i32, %arg1: i32) -> (i32, i32) {
    %c0_i32 = arith.constant 0 : i32
    %c0_i32_0 = arith.constant 0 : i32
    %c0_i32_1 = arith.constant 0 : i32
    return %c0_i32, %c0_i32_0 : i32, i32
  }
  func.func @transform_3(%arg0: i32, %arg1: i32) -> (i32, i32) {
    %c0_i32 = arith.constant 0 : i32
    %c0_i32_0 = arith.constant 0 : i32
    %c0_i32_1 = arith.constant 0 : i32
    return %c0_i32, %c0_i32_0 : i32, i32
  }
  func.func @transform_4(%arg0: i32, %arg1: i32) -> (i32, i32) {
    %c0_i32 = arith.constant 0 : i32
    %c0_i32_0 = arith.constant 0 : i32
    %c0_i32_1 = arith.constant 0 : i32
    return %c0_i32, %c0_i32_0 : i32, i32
  }
  func.func @transform_5(%arg0: i32, %arg1: i32) -> (i32, i32) {
    %c0_i32 = arith.constant 0 : i32
    %c0_i32_0 = arith.constant 0 : i32
    %c0_i32_1 = arith.constant 0 : i32
    return %c0_i32, %c0_i32_0 : i32, i32
  }
  func.func @transform_6(%arg0: i32, %arg1: i32) -> (i32, i32, i32) {
    %c0_i32 = arith.constant 0 : i32
    %c0_i32_0 = arith.constant 0 : i32
    return %arg0, %arg1, %c0_i32 : i32, i32, i32
  }
  func.func @transform_7(%arg0: i32, %arg1: i32) -> (i32, i32, i32, i32) {
    %c0_i32 = arith.constant 0 : i32
    %c0_i32_0 = arith.constant 0 : i32
    %c0_i32_1 = arith.constant 0 : i32
    return %arg0, %arg1, %c0_i32, %c0_i32_0 : i32, i32, i32, i32
  }
}

</mosaic_0001>

<bundles_post_ra>
// kernel: tpu_custom_call.1
= control target key start
LH: loop header
LB: loop body
LE: loop exit
PB: predicated region body
PF: predicated region fallthrough
CT: control target
= control target key end

     0   :  { %s2374_s0 = inlined_call_operand.hbm [shape: f32[2,128,256], index: 0, kind: input, shape index: {}]   ;;  %s2375_s1 = inlined_call_operand.hbm [shape: f32[2,256,128], index: 1, kind: input, shape index: {}]   ;;  %s2376_s2 = inlined_call_operand.hbm [shape: bf16[128,128], index: 2, kind: input, shape index: {}]   ;;  %s2377_s3 = inlined_call_operand.vmem [shape: f32[1,128], index: 3, kind: input, shape index: {}]   ;;  %s2378_s4 = inlined_call_operand.vmem [shape: f32[2,128], index: 4, kind: input, shape index: {}]   ;;  %s2379_s5 = inlined_call_operand.hbm [shape: bf16[128,128], index: 5, kind: input, shape index: {}]   ;;  %s2380_s6 = inlined_call_operand.hbm [shape: bf16[2,256,128], index: 6, kind: output, shape index: {0}]   ;;  %s2381_s7 = inlined_call_operand.hbm [shape: f32[2,2,8,128], index: 7, kind: output, shape index: {1}]  }
   0x1   :  { %2392 = sst [smem:[#allocation27_spill]] %s2374_s0 }
   0x2   :  { %2393 = sst [smem:[#allocation28_spill]] %s2376_s2 }
   0x3   :  { %2394 = sst [smem:[#allocation29_spill]] %s2379_s5 }
   0x4   :  { %2395 = sst [smem:[#allocation30_spill]] %s2380_s6 }
   0x5   :  { %2396 = sst [smem:[#allocation31_spill]] %s2381_s7 }
   0x6   :  { %13 = vsyncpa [#allocation3], 0 }
   0x7   :  { %15 = vsyncpa [#allocation3 + $0x1], 0 }
   0x8   :  { %16 = vsyncpa [#allocation6], 0 }
   0x9   :  { %18 = vsyncpa [#allocation6 + $0x1], 0 }
   0xa   :  { %19 = vsyncpa [#allocation9], 0 }
   0xb   :  { %20 = vsyncpa [#allocation4], 0 }
   0xc   :  { %22 = vsyncpa [#allocation4 + $0x1], 0 }
   0xd   :  { %23 = vsyncpa [#allocation12], 0 }
   0xe   :  { %25 = vsyncpa [#allocation12 + $0x1], 0  ;;  %s1856_s24 = smov 0   ;;  %s1858_s25 = smov 0  }
   0xf   :  { %s1860_s26 = smov 0   ;;  %s1862_s27 = smov 0  }
  0x10   :  { %s1864_s28 = smov 0   ;;  %s1866_s29 = smov 0  }
  0x11   :  { %s1868_s30 = smov 0   ;;  %s1870_s8 = smov 0  }
  0x12 LB: > { %2397 = sst [smem:[#allocation19_spill]] %s1775_s24  ;;  %s1897_s9 = sadd.s32 4294967295, %s1803_s8   ;;  %s1803_s8 = sphi %s1870_s8, %s31_s8   ;;  %s1799_s30 = sphi %s1868_s30, %s2423_s30   ;;  %s1795_s29 = sphi %s1866_s29, %s2429_s29   ;;  %s1791_s28 = sphi %s1864_s28, %s2428_s28   ;;  %s1787_s27 = sphi %s1862_s27, %s2427_s27   ;;  %s1783_s26 = sphi %s1860_s26, %s2426_s26   ;;  %s1779_s25 = sphi %s1858_s25, %s2425_s25   ;;  %s1775_s24 = sphi %s1856_s24, %s2424_s24  }
  0x13   : > { %2398 = sst [smem:[#allocation20_spill]] %s1787_s27  ;;  %s1219_s10 = sadd.s32 4294967294, %s1803_s8  }
  0x14   : > { %2399 = sst [smem:[#allocation21_spill]] %s1799_s30  ;;  %p65_p0 = scmp.ne.s32.totalorder %s1779_s25, %s1775_s24 }
  0x15   : > { %p66_p1 = scmp.eq.s32.totalorder %s1897_s9, 0  ;;  %p203_p2 = scmp.eq.s32.totalorder %s1897_s9, 3 }
  0x16   : > { %p209_p3 = scmp.eq.s32.totalorder %s1219_s10, 3  ;;  %p1220_p5 = scmp.ge.s32.totalorder %s1803_s8, 1 }
  0x17   : > { %p1906_p4 = por %p66_p1, %p65_p0  ;;  %p244_p7 = scmp.lt.s32.totalorder %s1803_s8, 5 }
  0x18   : > { %p1911_p6 = por %p209_p3, %p65_p0  ;;  %s2403_s2 = sld [smem:[#allocation28_spill]] }
  0x19   : > { %p1919_p8 = pnand %p1220_p5, %p244_p7  ;;  %s1805_s17 = smov [#allocation7]  }
  0x1a   : > { %s2401_s12 = scalar_select %p1911_p6, 1, 0 }
  0x1b   : > { %p1438_p9 = pneg %p1919_p8  ;;  %s257_s18 = sshll.u32 %s1805_s17, 4  ;;  %s258_s18 = int_to_ptr.vmem [resolvable:$true] %s257_s18 }
  0x1c   : > { %2402 = sst [smem:[#allocation22_spill]] %s2401_s12  ;;  %s1806_s22 = smov 64  }
  0x1d   : > { %p1439_p10 = pnand %p1438_p9, %p66_p1  ;;  %s2405_s5 = sld [smem:[#allocation29_spill]] }
  0x1e   : > { %s255_s15 = sshll.u32 %s2403_s2, 4  ;;  %s1807_s23 = smov 4   ;;  %s256_s15 = int_to_ptr.hbm [resolvable:$true] %s255_s15 }
  0x1f   : > { %1441 = dma.hbm_to_vmem [thread:$0]  (!%p1439_p10), %s256_s15, 1024, %s258_s18, [#allocation6], %s1806_s22, %s1806_s22, %s1807_s23  }
  0x20   : > { %s1808_s10 = smov [#allocation8]   ;;  %s40_s14 = sadd.s32 1, %s1795_s29 }
  0x21   : > { %s277_s13 = sshll.u32 %s1808_s10, 4  ;;  %s43_s17 = sadd.s32 1, %s1799_s30  ;;  %s278_s13 = int_to_ptr.vmem [resolvable:$true] %s277_s13 }
  0x22   : > { %p41_p11 = scmp.ge.s32.totalorder %s40_s14, 2  ;;  %s52_s19 = sadd.s32 1, %s1783_s26 }
  0x23   : > { %s275_s21 = sshll.u32 %s2405_s5, 4  ;;  %p59_p12 = scmp.ne.s32.totalorder %s1783_s26, %s1779_s25  ;;  %s276_s21 = int_to_ptr.hbm [resolvable:$true] %s275_s21 }
  0x24   : > { %1444 = dma.hbm_to_vmem [thread:$0]  (!%p1439_p10), %s276_s21, 1024, %s278_s13, [#allocation9], %s1806_s22, %s1806_s22, %s1807_s23  }
  0x25   : > { %p60_p13 = scmp.eq.s32.totalorder %s1803_s8, 0  ;;  %s2431_s14 = smov (%p41_p11, %s40_s14), 0 }
  0x26   : > { %2406 = sst [smem:[#allocation23_spill]] %s2431_s14  ;;  %s2433_s17 = smov (!%p41_p11, %s43_s17), %s1799_s30 }
  0x27   : > { %s48_s15 = ssub.s32 %s1795_s29, %s2431_s14  ;;  %p1941_p0 = por %p60_p13, %p59_p12 }
  0x28   : > { %p45_p3 = scmp.ge.s32.totalorder %s2433_s17, 2  ;;  %p1947_p5 = por %p203_p2, %p59_p12 }
  0x29   : > { %p1461_p7 = scmp.lt.s32.totalorder %s1803_s8, 4  ;;  %s291_s21 = sand.u32 1, %s1783_s26  }
  0x2a   : > { %s2408_s20 = scalar_select %p1947_p5, 1, 0 }
  0x2b   : > { %s2435_s17 = smov (%p45_p3, %s2433_s17), 0  ;;  %s1224_s22 = sshll.u32 %s291_s21, 7 }
  0x2c   : > { %2409 = sst [smem:[#allocation24_spill]] %s2408_s20  ;;  %s47_s23 = ssub.s32 %s1799_s30, %s2435_s17 }
  0x2d   : > { %2410 = sst [smem:[#allocation25_spill]] %s2435_s17  ;;  %s49_s10 = sor.u32 %s48_s15, %s47_s23 }
  0x2e   : > { %s1225_s13 = sshll.u32 %s1799_s30, 5  ;;  %p50_p9 = scmp.eq.s32.totalorder %s49_s10, 0 }
  0x2f   : > { %s299_s2 = sadd.s32 %s1795_s29, %s1225_s13  ;;  %s295_s14 = scalar_lea.vmem [#allocation2], %s1224_s22 }
  0x30   : > { %s1226_s5 = sshll.u32 %s299_s2, 3  ;;  %s304_s12 = sshll.u32 %s295_s14, 4  ;;  %s305_s12 = int_to_ptr.vmem [resolvable:$true] %s304_s12 }
  0x31   : > { %s1960_s24 = scalar_select %p50_p9, %s1783_s26, %s52_s19  }
  0x32   : > { %s2412_s0 = sld [smem:[#allocation27_spill]]  ;;  %p1969_p2 = pnand %p1461_p7, %p1941_p0 }
  0x33   : > { %2411 = sst [smem:[#allocation26_spill]] %s1960_s24  ;;  %s292_s23 = scalar_lea.sflag [#allocation3], %s291_s21 }
  0x34   : > { %s1809_s2 = smov 256   ;;  %s1810_s14 = smov 128  }
  0x35   : > { %s1811_s19 = smov 8   ;;  %s314_s10 = sand.u32 1, %s1803_s8  }
  0x36   : > { %s1228_s6 = sshll.u32 %s1795_s29, 4  ;;  %s315_s21 = scalar_lea.sflag [#allocation6], %s314_s10 }
  0x38   : > { %s301_s7 = scalar_lea.hbm %s2412_s0, %s1226_s5  ;;  %s318_s5 = scalar_lea.vmem [#allocation5], %s1224_s22 }
  0x39   : > { %s302_s27 = sshll.u32 %s301_s7, 4  ;;  %s328_s20 = sshll.u32 %s318_s5, 4  ;;  %s303_s27 = int_to_ptr.hbm [resolvable:$true] %s302_s27  ;;  %s329_s20 = int_to_ptr.vmem [resolvable:$true] %s328_s20 }
  0x3a   : > { %1448 = dma.hbm_to_vmem [thread:$0]  (!%p1969_p2), %s303_s27, 2048, %s305_s12, %s292_s23, %s1809_s2, %s1810_s14, %s1811_s19  }
  0x3b   : > { %s323_s7 = sadd.s32 %s1228_s6, %s1225_s13  ;;  %340 = sbr.rel (%p1919_p8) target bundleno = 820 (0x334), region = 44 }
  0x3c   : > { %s1230_s18 = sshll.u32 %s323_s7, 3  ;;  %s1985_s27 = sand.u32 (!%p1919_p8), 1, %s1779_s25  }
  0x3d   : > { %s325_s30 = scalar_lea.hbm %s2375_s1, %s1230_s18  ;;  %s1232_s12 = sshll.u32 (!%p1919_p8), %s1985_s27, 7 }
  0x3e   : > { %s326_s24 = sshll.u32 %s325_s30, 4  ;;  %s343_s22 = scalar_lea.sflag (!%p1919_p8), [#allocation3], %s1985_s27  ;;  %s327_s24 = int_to_ptr.hbm [resolvable:$true] %s326_s24 }
  0x3f   : > { %1451 = dma.hbm_to_vmem [thread:$0]  (!%p1969_p2), %s327_s24, 2048, %s329_s20, %s315_s21, %s1810_s14, %s1810_s14, %s1811_s19  }
  0x40   : > { %s1989_s13 = scalar_lea.vmem [#allocation2], %s1232_s12 }
  0x41   : > { %1750 = dma.done.wait (%p1906_p4), %s343_s22, 2048  }
  0x42   : > { %1752 = vsyncadd (%p1906_p4), %s343_s22, 4294965248  ;;  %s352_s0 = sand.u32 1, %s1897_s9   ;;  %s1996_s30 = scalar_lea.vmem [#allocation5], %s1232_s12 }
  0x43   : > { %s353_s24 = scalar_lea.sflag [#allocation6], %s352_s0 }
  0x44   : > { %1754 = dma.done.wait (%p1906_p4), %s353_s24, 2048  }
  0x45   : > { %1756 = vsyncadd (%p1906_p4), %s353_s24, 4294965248 }
  0x46   : > { %1758 = dma.done.wait (%p66_p1), [#allocation6], 1024  }
  0x47   : > { %1760 = vsyncadd (%p66_p1), [#allocation6], 4294966272 }
  0x48   : > { %1762 = dma.done.wait (%p66_p1), [#allocation9], 1024  }
  0x49   : > { %1764 = vsyncadd (%p66_p1), [#allocation9], 4294966272  ;;  %v411_v0 = vld [vmem:[%s1989_s13] sm:$0xff]  ;;  %v412_v1 = vld [vmem:[%s1989_s13 + $0x8] sm:$0xff]  ;;  %s1236_s15 = sshll.u32 %s1985_s27, 6  ;;  %s2414_s2 = sld [smem:[#allocation20_spill]] }
  0x4a   : > { %v427_v2 = vpack.c.bf16 %v412_v1, %v411_v0  ;;  %v413_v3 = vld [vmem:[%s1989_s13 + $0x10] sm:$0xff]  ;;  %v414_v4 = vld [vmem:[%s1989_s13 + $0x18] sm:$0xff]  ;;  %v415_v6 = vld [vmem:[%s1989_s13 + $0x20] sm:$0xff]  ;;  %s2288_s23 = scalar_lea.vmem [#allocation10], %s1236_s15  ;;  %s1339_s14 = sshll.u32 %s1791_s28, 1 }
  0x4b   : > { %v428_v5 = vpack.c.bf16 %v414_v4, %v413_v3  ;;  %v416_v7 = vld [vmem:[%s1989_s13 + $0x28] sm:$0xff]  ;;  %v417_v9 = vld [vmem:[%s1989_s13 + $0x30] sm:$0xff]  ;;  %v418_v10 = vld [vmem:[%s1989_s13 + $0x38] sm:$0xff]  ;;  %s1337_s10 = sshll.u32 %s1791_s28, 5  ;;  %s1237_s7 = sshll.u32 %s1985_s27, 3 }
  0x4c   : > { %455 = vxpose.xlu0.c.b16.start [1/8] %v427_v2, 128  ;;  %v429_v8 = vpack.c.bf16 %v416_v7, %v415_v6  ;;  %v430_v11 = vpack.c.bf16 %v418_v10, %v417_v9  ;;  %v419_v12 = vld [vmem:[%s1989_s13 + $0x40] sm:$0xff]  ;;  %v420_v13 = vld [vmem:[%s1989_s13 + $0x48] sm:$0xff]  ;;  %v421_v15 = vld [vmem:[%s1989_s13 + $0x50] sm:$0xff]  ;;  %s2415_s22 = sld [smem:[#allocation31_spill]]  ;;  %s407_s0 = scalar_lea.vmem [#allocation11], %s1237_s7 }
  0x4d   : > { %v431_v14 = vpack.c.bf16 %v420_v13, %v419_v12  ;;  %v422_v16 = vld [vmem:[%s1989_s13 + $0x58] sm:$0xff]  ;;  %v1349_v19 = vld [vmem:[#allocation7 + $0x30] sm:$0xff]  ;;  %v1348_v20 = vld [vmem:[#allocation7 + $0x28] sm:$0xff]  ;;  %s1049_s24 = sshll.u32 %s407_s0, 4  ;;  %s2416_s11 = sld [smem:[#allocation30_spill]]  ;;  %s1050_s24 = int_to_ptr.vmem [resolvable:$true] %s1049_s24 }
  0x4e   : > { %v432_v17 = vpack.c.bf16 %v422_v16, %v421_v15  ;;  %v1350_v18 = vld [vmem:[#allocation7 + $0x38] sm:$0xff]  ;;  %v423_v21 = vld [vmem:[%s1989_s13 + $0x60] sm:$0xff]  ;;  %v424_v22 = vld [vmem:[%s1989_s13 + $0x68] sm:$0xff]  ;;  %s1030_s15 = sshll.u32 %s2288_s23, 4  ;;  %s2316_s15 = int_to_ptr.vmem [resolvable:$true] %s1030_s15 }
  0x4f   : > { %519 = vmatpush.bf16.msra.mxu0 %v1350_v18  ;;  %1406 = vmatpush.bf16.msra.mxu3 %v1350_v18  ;;  %v1347_v23 = vld [vmem:[#allocation7 + $0x20] sm:$0xff]  ;;  %v433_v24 = vpack.c.bf16 %v424_v22, %v423_v21  ;;  %v1346_v25 = vld [vmem:[#allocation7 + $0x18] sm:$0xff]  ;;  %v1345_v26 = vld [vmem:[#allocation7 + $0x10] sm:$0xff]  ;;  %s1336_s19 = sshll.u32 %s2414_s2, 4  ;;  %s1045_s6 = sadd.s32 %s2414_s2, %s1339_s14 }
  0x50   : > { %v1344_v27 = vld [vmem:[#allocation7 + $0x8] sm:$0xff]  ;;  %v425_v28 = vld [vmem:[%s1989_s13 + $0x70] sm:$0xff]  ;;  %v426_v29 = vld [vmem:[%s1989_s13 + $0x78] sm:$0xff]  ;;  %s1027_s5 = sadd.s32 %s1337_s10, %s1336_s19  ;;  %s1340_s20 = sshll.u32 %s1045_s6, 3 }
  0x51   : > { %v1343_v30 = vld [vmem:[#allocation7] sm:$0xff]  ;;  %v434_v31 = vpack.c.bf16 %v426_v29, %v425_v28  ;;  %v569_v52 = vld [vmem:[%s1996_s30 + $0x8] sm:$0xff]  ;;  %v570_v59 = vld [vmem:[%s1996_s30 + $0x10] sm:$0xff]  ;;  %s1338_s18 = sshll.u32 %s1027_s5, 2  ;;  %s1016_s14 = scalar_lea.sflag [#allocation12], %s1985_s27 }
  0x52   : > { %v2029_v40 = vld [vmem:[%s2377_s3] ss:$0 sm:$0xff]  ;;  %v571_v1 = vld [vmem:[%s1996_s30 + $0x18] sm:$0xff]  ;;  %v573_v15 = vld [vmem:[%s1996_s30 + $0x28] sm:$0xff]  ;;  %s1047_s13 = scalar_lea.hbm %s2415_s22, %s1340_s20  ;;  %s1681_s20 = scalar_lea.hbm %s2415_s22, 32 }
  0x53   : > { %520 = vmatpush.bf16.msra.mxu0 %v1349_v19  ;;  %1407 = vmatpush.bf16.msra.mxu3 %v1349_v19  ;;  %v568_v42 = vld [vmem:[%s1996_s30] sm:$0xff]  ;;  %v574_v22 = vld [vmem:[%s1996_s30 + $0x30] sm:$0xff]  ;;  %s1029_s16 = scalar_lea.hbm %s2416_s11, %s1338_s18  ;;  %s1051_s17 = sshll.u32 %s1047_s13, 4  ;;  %s1052_s17 = int_to_ptr.hbm [resolvable:$true] %s1051_s17 }
  0x54   : > { %v616_v43 = vld [vmem:[%s2378_s4] sm:$0x3]  ;;  %s1032_s2 = sshll.u32 %s1029_s16, 4  ;;  %s1675_s19 = sshra.s32 %s1052_s17, 4  ;;  %s2318_s2 = int_to_ptr.hbm [resolvable:$true] %s1032_s2  ;;  %s1676_s19 = int_to_ptr.hbm [resolvable:$true] %s1675_s19 }
  0x55   : > { %v2036_v46 = vperm.slane %v616_v43, 1  ;;  %v2038_v47 = vperm.slane %v616_v43, 0  ;;  %v1357_v43 = vld [vmem:[#allocation8 + $0x30] sm:$0xff]  ;;  %s1677_s10 = scalar_lea.hbm %s1676_s19, 8  ;;  %p1682_p10 = scmp.lt.s32.totalorder %s1676_s19, %s2415_s22 }
  0x56   : > { %p1678_p1 = scmp.ne.s32.totalorder %s1676_s19, %s1677_s10  ;;  %p1683_p11 = scmp.lt.s32.totalorder %s1681_s20, %s1677_s10 }
  0x57   : > { %521 = vmatpush.bf16.msra.mxu0 %v1348_v20  ;;  %1408 = vmatpush.bf16.msra.mxu3 %v1348_v20 }
  0x58   : > { %p1679_p4 = pnand %p1678_p1, %p1947_p5  ;;  %p1684_p12 = por %p1683_p11, %p1682_p10 }
  0x5a   : > { %p1680_p8 = pneg %p1679_p4 }
  0x5b   : > { %522 = vmatpush.bf16.msra.mxu0 %v1347_v23  ;;  %1409 = vmatpush.bf16.msra.mxu3 %v1347_v23 }
  0x5c   : > { %456 = vxpose.xlu0.c.b16.cont [2/8] %v428_v5, 128  ;;  %p1685_p13 = pnand %p1684_p12, %p1680_p8 }
  0x5f   : > { %523 = vmatpush.bf16.msra.mxu0 %v1346_v25  ;;  %1410 = vmatpush.bf16.msra.mxu3 %v1346_v25 }
  0x63   : > { %524 = vmatpush.bf16.msra.mxu0 %v1345_v26  ;;  %1411 = vmatpush.bf16.msra.mxu3 %v1345_v26 }
  0x67   : > { %525 = vmatpush.bf16.msra.mxu0 %v1344_v27  ;;  %1412 = vmatpush.bf16.msra.mxu3 %v1344_v27 }
  0x6b   : > { %526 = vmatpush.bf16.msra.mxu0 %v1343_v30  ;;  %1413 = vmatpush.bf16.msra.mxu3 %v1343_v30  ;;  %v576_v30 = vld [vmem:[%s1996_s30 + $0x40] sm:$0xff] }
  0x6c   : > { %457 = vxpose.xlu0.c.b16.cont [3/8] %v429_v8, 128  ;;  %v572_v8 = vld [vmem:[%s1996_s30 + $0x20] sm:$0xff] }
  0x7c   : > { %458 = vxpose.xlu0.c.b16.cont [4/8] %v430_v11, 128 }
  0x8c   : > { %459 = vxpose.xlu0.c.b16.cont [5/8] %v431_v14, 128 }
  0x9c   : > { %460 = vxpose.xlu0.c.b16.cont [6/8] %v432_v17, 128 }
  0xac   : > { %461 = vxpose.xlu0.c.b16.cont [7/8] %v433_v24, 128 }
  0xbc   : > { %462 = vxpose.xlu0.c.b16.end [8/8] %v434_v31, 128 }
  0xf8   : > { %v463_v32 = vpop.trf.xlu0 }
  0xf9   : > { %527 = vmatmul.bf16.vlgmr.msra.gmra.mxu0 %v463_v32 }
 0x108   : > { %v464_v33 = vpop.trf.xlu0 }
 0x109   : > { %532 = vmatmul.bf16.gmra.mxu0 %v464_v33 }
 0x118   : > { %v465_v34 = vpop.trf.xlu0 }
 0x119   : > { %537 = vmatmul.bf16.gmra.mxu0 %v465_v34 }
 0x128   : > { %v466_v35 = vpop.trf.xlu0 }
 0x129   : > { %542 = vmatmul.bf16.gmra.mxu0 %v466_v35 }
 0x138   : > { %v467_v36 = vpop.trf.xlu0 }
 0x139   : > { %547 = vmatmul.bf16.gmra.mxu0 %v467_v36  ;;  %v577_v36 = vld [vmem:[%s1996_s30 + $0x48] sm:$0xff] }
 0x148   : > { %v468_v37 = vpop.trf.xlu0 }
 0x149   : > { %552 = vmatmul.bf16.vlgmr.msra.gmra.mxu3 %v468_v37 }
 0x158   : > { %v469_v38 = vpop.trf.xlu0 }
 0x159   : > { %557 = vmatmul.bf16.gmra.mxu3 %v469_v38  ;;  %v1358_v38 = vld [vmem:[#allocation8 + $0x38] sm:$0xff] }
 0x15a   : > { %915 = vmatpush.bf16.msra.mxu1 %v1358_v38  ;;  %1414 = vmatpush.bf16.msra.mxu2 %v1358_v38 }
 0x15e   : > { %916 = vmatpush.bf16.msra.mxu1 %v1357_v43  ;;  %1415 = vmatpush.bf16.msra.mxu2 %v1357_v43 }
 0x168   : > { %v470_v39 = vpop.trf.xlu0 }
 0x169   : > { %562 = vmatmul.bf16.gmra.mxu3 %v470_v39 }
 0x176   : > { %v528_v41 = vpop.f32.mrf.mxu0 }
 0x177   : > { %v529_v44 = vadd.f32 %v2029_v40, %v528_v41 }
 0x179   : > { %v584_v45 = vadd.f32 %v568_v42, %v529_v44 }
 0x17b   : > { %v600_v48 = vmul.f32 2.0, %v584_v45  ;;  %v1356_v45 = vld [vmem:[#allocation8 + $0x28] sm:$0xff] }
 0x17c   : > { %917 = vmatpush.bf16.msra.mxu1 %v1356_v45  ;;  %1416 = vmatpush.bf16.msra.mxu2 %v1356_v45 }
 0x17d   : > { %v2041_v49 = vadd.f32 %v2036_v46, %v600_v48  ;;  %v2044_v50 = vadd.f32 %v2038_v47, %v600_v48 }
 0x17e   : > { %v530_v51 = vpop.f32.mrf.mxu0 }
 0x17f   : > { %v531_v53 = vadd.f32 %v2029_v40, %v530_v51  ;;  %747 = vmax.xlane.f32.xlu2 %v2041_v49  ;;  %634 = vmax.xlane.f32.xlu1 %v2044_v50  ;;  %v578_v51 = vld [vmem:[%s1996_s30 + $0x50] sm:$0xff] }
 0x181   : > { %v585_v54 = vadd.f32 %v569_v52, %v531_v53  ;;  %v1355_v52 = vld [vmem:[#allocation8 + $0x20] sm:$0xff] }
 0x182   : > { %918 = vmatpush.bf16.msra.mxu1 %v1355_v52  ;;  %1417 = vmatpush.bf16.msra.mxu2 %v1355_v52 }
 0x183   : > { %v601_v55 = vmul.f32 2.0, %v585_v54 }
 0x185   : > { %v2051_v56 = vadd.f32 %v2036_v46, %v601_v55  ;;  %v2054_v57 = vadd.f32 %v2038_v47, %v601_v55  ;;  %v1354_v55 = vld [vmem:[#allocation8 + $0x18] sm:$0xff] }
 0x186   : > { %v533_v58 = vpop.f32.mrf.mxu0  ;;  %919 = vmatpush.bf16.msra.mxu1 %v1354_v55  ;;  %1418 = vmatpush.bf16.msra.mxu2 %v1354_v55 }
 0x187   : > { %v534_v60 = vadd.f32 %v2029_v40, %v533_v58  ;;  %749 = vmax.xlane.f32.xlu2 %v2051_v56  ;;  %636 = vmax.xlane.f32.xlu1 %v2054_v57 }
 0x189   : > { %v586_v61 = vadd.f32 %v570_v59, %v534_v60 }
 0x18b   : > { %v602_v62 = vmul.f32 2.0, %v586_v61  ;;  %v579_v61 = vld [vmem:[%s1996_s30 + $0x58] sm:$0xff] }
 0x18d   : > { %v2061_v63 = vadd.f32 %v2038_v47, %v602_v62  ;;  %v2067_v5 = vadd.f32 %v2036_v46, %v602_v62  ;;  %v1353_v62 = vld [vmem:[#allocation8 + $0x10] sm:$0xff] }
 0x18e   : > { %v535_v0 = vpop.f32.mrf.mxu0  ;;  %920 = vmatpush.bf16.msra.mxu1 %v1353_v62  ;;  %1419 = vmatpush.bf16.msra.mxu2 %v1353_v62 }
 0x18f   : > { %v536_v2 = vadd.f32 %v2029_v40, %v535_v0  ;;  %638 = vmax.xlane.f32.xlu1 %v2061_v63 }
 0x191   : > { %v587_v3 = vadd.f32 %v571_v1, %v536_v2  ;;  %v1352_v2 = vld [vmem:[#allocation8 + $0x8] sm:$0xff] }
 0x192   : > { %921 = vmatpush.bf16.msra.mxu1 %v1352_v2  ;;  %1420 = vmatpush.bf16.msra.mxu2 %v1352_v2 }
 0x193   : > { %v603_v4 = vmul.f32 2.0, %v587_v3 }
 0x195   : > { %v2070_v6 = vadd.f32 %v2038_v47, %v603_v4  ;;  %v2077_v12 = vadd.f32 %v2036_v46, %v603_v4 }
 0x196   : > { %v538_v7 = vpop.f32.mrf.mxu0 }
 0x197   : > { %v539_v9 = vadd.f32 %v2029_v40, %v538_v7  ;;  %640 = vmax.xlane.f32.xlu2 %v2070_v6  ;;  %751 = vmax.xlane.f32.xlu1 %v2067_v5 }
 0x199   : > { %v588_v10 = vadd.f32 %v572_v8, %v539_v9  ;;  %v580_v9 = vld [vmem:[%s1996_s30 + $0x60] sm:$0xff] }
 0x19b   : > { %v604_v11 = vmul.f32 2.0, %v588_v10  ;;  %v1351_v10 = vld [vmem:[#allocation8] sm:$0xff] }
 0x19c   : > { %922 = vmatpush.bf16.msra.mxu1 %v1351_v10  ;;  %1421 = vmatpush.bf16.msra.mxu2 %v1351_v10 }
 0x19d   : > { %v2080_v13 = vadd.f32 %v2038_v47, %v604_v11  ;;  %v2087_v19 = vadd.f32 %v2036_v46, %v604_v11 }
 0x19e   : > { %v540_v14 = vpop.f32.mrf.mxu0 }
 0x19f   : > { %v541_v16 = vadd.f32 %v2029_v40, %v540_v14  ;;  %753 = vmax.xlane.f32.xlu2 %v2077_v12  ;;  %642 = vmax.xlane.f32.xlu1 %v2080_v13 }
 0x1a1   : > { %v589_v17 = vadd.f32 %v573_v15, %v541_v16 }
 0x1a3   : > { %v605_v18 = vmul.f32 2.0, %v589_v17 }
 0x1a5   : > { %v2090_v20 = vadd.f32 %v2038_v47, %v605_v18  ;;  %v2099_v26 = vadd.f32 %v2036_v46, %v605_v18 }
 0x1a6   : > { %v543_v21 = vpop.f32.mrf.mxu0 }
 0x1a7   : > { %v544_v23 = vadd.f32 %v2029_v40, %v543_v21  ;;  %644 = vmax.xlane.f32.xlu2 %v2090_v20  ;;  %755 = vmax.xlane.f32.xlu1 %v2087_v19  ;;  %v581_v21 = vld [vmem:[%s1996_s30 + $0x68] sm:$0xff] }
 0x1a9   : > { %v590_v24 = vadd.f32 %v574_v22, %v544_v23 }
 0x1ab   : > { %v2096_v25 = vmul.f32 2.0, %v590_v24 }
 0x1ad   : > { %v2103_v27 = vadd.f32 %v2036_v46, %v2096_v25 }
 0x1ae   : > { %v2105_v28 = vpop.f32.mrf.mxu0 }
 0x1af   : > { %757 = vmax.xlane.f32.xlu2 %v2099_v26  ;;  %759 = vmax.xlane.f32.xlu0 %v2103_v27 }
 0x1b6   : > { %v548_v29 = vpop.f32.mrf.mxu0 }
 0x1b7   : > { %v549_v31 = vadd.f32 %v2029_v40, %v548_v29 }
 0x1b9   : > { %v592_v32 = vadd.f32 %v576_v30, %v549_v31 }
 0x1bb   : > { %v608_v33 = vmul.f32 2.0, %v592_v32  ;;  %v582_v32 = vld [vmem:[%s1996_s30 + $0x70] sm:$0xff] }
 0x1bd   : > { %v2112_v34 = vadd.f32 %v2038_v47, %v608_v33  ;;  %v2120_v42 = vadd.f32 %v2036_v46, %v608_v33 }
 0x1be   : > { %v550_v35 = vpop.f32.mrf.mxu0 }
 0x1bf   : > { %v551_v37 = vadd.f32 %v2029_v40, %v550_v35  ;;  %650 = vmax.xlane.f32.xlu1 %v2112_v34 }
 0x1c1   : > { %v593_v39 = vadd.f32 %v577_v36, %v551_v37 }
 0x1c3   : > { %v2117_v41 = vmul.f32 2.0, %v593_v39 }
 0x1c5   : > { %v2124_v44 = vadd.f32 %v2038_v47, %v2117_v41 }
 0x1c7   : > { %652 = vmax.xlane.f32.xlu2 %v2124_v44  ;;  %763 = vmax.xlane.f32.xlu1 %v2120_v42 }
 0x1cc   : > { %v553_v48 = vpop.f32.mrf.mxu3 }
 0x1cd   : > { %v554_v53 = vadd.f32 %v2029_v40, %v553_v48  ;;  %v583_v48 = vld [vmem:[%s1996_s30 + $0x78] sm:$0xff] }
 0x1cf   : > { %v594_v54 = vadd.f32 %v578_v51, %v554_v53 }
 0x1d1   : > { %v610_v58 = vmul.f32 2.0, %v594_v54  ;;  %v1812_v54 = vmov 0.0  }
 0x1d3   : > { %v2131_v59 = vadd.f32 %v2038_v47, %v610_v58  ;;  %v2140_v7 = vadd.f32 %v2036_v46, %v610_v58 }
 0x1d4   : > { %v555_v60 = vpop.f32.mrf.mxu3 }
 0x1d5   : > { %v556_v0 = vadd.f32 %v2029_v40, %v555_v60  ;;  %654 = vmax.xlane.f32.xlu1 %v2131_v59 }
 0x1d7   : > { %v595_v1 = vadd.f32 %v579_v61, %v556_v0 }
 0x1d9   : > { %v611_v3 = vmul.f32 2.0, %v595_v1 }
 0x1db   : > { %v2137_v4 = vadd.f32 %v2038_v47, %v611_v3  ;;  %v2147_v16 = vadd.f32 %v2036_v46, %v611_v3  ;;  %v575_v3 = vld [vmem:[%s1996_s30 + $0x38] sm:$0xff] }
 0x1dc   : > { %v558_v8 = vpop.f32.mrf.mxu3 }
 0x1dd   : > { %v559_v11 = vadd.f32 %v2029_v40, %v558_v8  ;;  %656 = vmax.xlane.f32.xlu2 %v2137_v4  ;;  %767 = vmax.xlane.f32.xlu1 %v2140_v7 }
 0x1df   : > { %v596_v14 = vadd.f32 %v580_v9, %v559_v11  ;;  %v2203_v11 = vadd.f32 %v2038_v47, %v2096_v25 }
 0x1e1   : > { %v612_v15 = vmul.f32 2.0, %v596_v14 }
 0x1e3   : > { %v2150_v17 = vadd.f32 %v2038_v47, %v612_v15  ;;  %v2160_v30 = vadd.f32 %v2036_v46, %v612_v15  ;;  %v2209_v15 = vadd.f32 %v2036_v46, %v2117_v41 }
 0x1e4   : > { %v560_v18 = vpop.f32.mrf.mxu3 }
 0x1e5   : > { %v561_v22 = vadd.f32 %v2029_v40, %v560_v18  ;;  %769 = vmax.xlane.f32.xlu2 %v2147_v16  ;;  %658 = vmax.xlane.f32.xlu1 %v2150_v17 }
 0x1e7   : > { %v597_v23 = vadd.f32 %v581_v21, %v561_v22 }
 0x1e9   : > { %v613_v24 = vmul.f32 2.0, %v597_v23 }
 0x1eb   : > { %v2157_v29 = vadd.f32 %v2038_v47, %v613_v24  ;;  %v2167_v39 = vadd.f32 %v2036_v46, %v613_v24 }
 0x1ec   : > { %v563_v31 = vpop.f32.mrf.mxu3 }
 0x1ed   : > { %v564_v33 = vadd.f32 %v2029_v40, %v563_v31  ;;  %660 = vmax.xlane.f32.xlu2 %v2157_v29  ;;  %771 = vmax.xlane.f32.xlu1 %v2160_v30 }
 0x1ef   : > { %v598_v35 = vadd.f32 %v582_v32, %v564_v33 }
 0x1f1   : > { %v614_v36 = vmul.f32 2.0, %v598_v35 }
 0x1f2   : > { %v748_v37 = vpop.xlane.xlu2 %747  ;;  %v635_v38 = vpop.xlane.xlu1 %634 }
 0x1f3   : > { %v2170_v43 = vadd.f32 %v2038_v47, %v614_v36  ;;  %vm779_vm0 = vcmp.eq.f32.partialorder %v2041_v49, %v748_v37  ;;  %vm666_vm1 = vcmp.eq.f32.partialorder %v2044_v50, %v635_v38  ;;  %v2186_v49 = vadd.f32 %v2036_v46, %v614_v36 }
 0x1f4   : > { %v565_v45 = vpop.f32.mrf.mxu3  ;;  %v1286_v55 = vsel %vm779_vm0, 1.0, %v1812_v54  ;;  %v1270_v58 = vsel %vm666_vm1, 1.0, %v1812_v54 }
 0x1f5   : > { %v566_v51 = vadd.f32 %v2029_v40, %v565_v45  ;;  %773 = vmax.xlane.f32.xlu2 %v2167_v39  ;;  %662 = vmax.xlane.f32.xlu1 %v2170_v43  ;;  %v827_v1 = vadd.f32 %v1286_v55, %v1270_v58 }
 0x1f7   : > { %v599_v52 = vadd.f32 %v583_v48, %v566_v51 }
 0x1f9   : > { %v615_v53 = vmul.f32 2.0, %v599_v52 }
 0x1fa   : > { %v750_v60 = vpop.xlane.xlu2 %749  ;;  %v637_v61 = vpop.xlane.xlu1 %636 }
 0x1fb   : > { %vm780_vm2 = vcmp.eq.f32.partialorder %v2051_v56, %v750_v60  ;;  %vm667_vm3 = vcmp.eq.f32.partialorder %v2054_v57, %v637_v61  ;;  %v2183_v62 = vadd.f32 %v2038_v47, %v615_v53  ;;  %v546_v56 = vadd.f32 %v2029_v40, %v2105_v28 }
 0x1fc   : > { %v1287_v50 = vsel %vm780_vm2, 1.0, %v1812_v54  ;;  %v1271_v0 = vsel %vm667_vm3, 1.0, %v1812_v54  ;;  %v2199_v10 = vadd.f32 %v2036_v46, %v615_v53 }
 0x1fd   : > { %v828_v2 = vadd.f32 %v1287_v50, %v1271_v0  ;;  %664 = vmax.xlane.f32.xlu2 %v2183_v62  ;;  %775 = vmax.xlane.f32.xlu1 %v2186_v49  ;;  %v591_v9 = vadd.f32 %v575_v3, %v546_v56 }
 0x1ff   : > { %v2194_v57 = vpack.c.bf16 %v828_v2, %v827_v1  ;;  %v607_v14 = vmul.f32 2.0, %v591_v9 }
 0x201   : > { %923 = vmatmul.bf16.vlgmr.msra.gmra.mxu1 %v2194_v57  ;;  %v2212_v18 = vadd.f32 %v2036_v46, %v607_v14  ;;  %v2222_v41 = vadd.f32 %v2038_v47, %v607_v14 }
 0x202   : > { %v639_v8 = vpop.xlane.xlu1 %638 }
 0x203   : > { %vm668_vm5 = vcmp.eq.f32.partialorder %v2061_v63, %v639_v8 }
 0x204   : > { %v1272_v46 = vsel %vm668_vm5, 1.0, %v1812_v54 }
 0x205   : > { %777 = vmax.xlane.f32.xlu2 %v2199_v10  ;;  %646 = vmax.xlane.f32.xlu1 %v2203_v11 }
 0x20a   : > { %v641_v40 = vpop.xlane.xlu2 %640  ;;  %v752_v28 = vpop.xlane.xlu1 %751 }
 0x20b   : > { %vm781_vm4 = vcmp.eq.f32.partialorder %v2067_v5, %v752_v28  ;;  %vm669_vm6 = vcmp.eq.f32.partialorder %v2070_v6, %v641_v40 }
 0x20c   : > { %v1288_v25 = vsel %vm781_vm4, 1.0, %v1812_v54  ;;  %v1273_v23 = vsel %vm669_vm6, 1.0, %v1812_v54 }
 0x20d   : > { %765 = vmax.xlane.f32.xlu2 %v2209_v15  ;;  %761 = vmax.xlane.f32.xlu1 %v2212_v18  ;;  %v829_v5 = vadd.f32 %v1288_v25, %v1272_v46 }
 0x212   : > { %v754_v21 = vpop.xlane.xlu2 %753  ;;  %v643_v22 = vpop.xlane.xlu1 %642 }
 0x213   : > { %vm782_vm7 = vcmp.eq.f32.partialorder %v2077_v12, %v754_v21  ;;  %vm670_vm9 = vcmp.eq.f32.partialorder %v2080_v13, %v643_v22 }
 0x214   : > { %v1289_v24 = vsel %vm782_vm7, 1.0, %v1812_v54  ;;  %v1274_v33 = vsel %vm670_vm9, 1.0, %v1812_v54 }
 0x215   : > { %v830_v31 = vadd.f32 %v1289_v24, %v1273_v23  ;;  %648 = vmax.xlane.f32.xlu2 %v2222_v41 }
 0x217   : > { %v2228_v63 = vpack.c.bf16 %v830_v31, %v829_v5 }
 0x219   : > { %928 = vmatmul.bf16.gmra.mxu1 %v2228_v63 }
 0x21a   : > { %v645_v6 = vpop.xlane.xlu2 %644  ;;  %v756_v32 = vpop.xlane.xlu1 %755 }
 0x21b   : > { %vm783_vm8 = vcmp.eq.f32.partialorder %v2087_v19, %v756_v32  ;;  %vm671_vm10 = vcmp.eq.f32.partialorder %v2090_v20, %v645_v6 }
 0x21c   : > { %v1290_v47 = vsel %vm783_vm8, 1.0, %v1812_v54  ;;  %v1275_v35 = vsel %vm671_vm10, 1.0, %v1812_v54 }
 0x21d   : > { %v831_v37 = vadd.f32 %v1290_v47, %v1274_v33 }
 0x222   : > { %v758_v12 = vpop.xlane.xlu2 %757 }
 0x223   : > { %vm784_vm11 = vcmp.eq.f32.partialorder %v2099_v26, %v758_v12 }
 0x224   : > { %v1291_v36 = vsel %vm784_vm11, 1.0, %v1812_v54 }
 0x225   : > { %v832_v38 = vadd.f32 %v1291_v36, %v1275_v35 }
 0x227   : > { %v2239_v45 = vpack.c.bf16 %v832_v38, %v831_v37 }
 0x229   : > { %933 = vmatmul.bf16.gmra.mxu1 %v2239_v45 }
 0x232   : > { %v2242_v13 = vpop.xlane.xlu1 %650 }
 0x233   : > { %vm674_vm11 = vcmp.eq.f32.partialorder %v2112_v34, %v2242_v13 }
 0x23a   : > { %v2244_v19 = vpop.xlane.xlu1 %763  ;;  %v2246_v20 = vpop.xlane.xlu2 %652 }
 0x23b   : > { %vm675_vm9 = vcmp.eq.f32.partialorder %v2124_v44, %v2246_v20  ;;  %vm787_vm10 = vcmp.eq.f32.partialorder %v2120_v42, %v2244_v19  ;;  %v1278_v42 = vsel %vm674_vm11, 1.0, %v1812_v54 }
 0x23c   : > { %v1279_v31 = vsel %vm675_vm9, 1.0, %v1812_v54  ;;  %v1294_v6 = vsel %vm787_vm10, 1.0, %v1812_v54 }
 0x23d   : > { %v835_v47 = vadd.f32 %v1294_v6, %v1278_v42 }
 0x248   : > { %v655_v48 = vpop.xlane.xlu1 %654 }
 0x249   : > { %vm676_vm13 = vcmp.eq.f32.partialorder %v2131_v59, %v655_v48 }
 0x24a   : > { %v1280_v58 = vsel %vm676_vm13, 1.0, %v1812_v54 }
 0x250   : > { %v657_v26 = vpop.xlane.xlu2 %656  ;;  %v768_v51 = vpop.xlane.xlu1 %767 }
 0x251   : > { %vm789_vm12 = vcmp.eq.f32.partialorder %v2140_v7, %v768_v51  ;;  %vm677_vm14 = vcmp.eq.f32.partialorder %v2137_v4, %v657_v26 }
 0x252   : > { %v1296_v52 = vsel %vm789_vm12, 1.0, %v1812_v54  ;;  %v1281_v60 = vsel %vm677_vm14, 1.0, %v1812_v54 }
 0x253   : > { %v837_v50 = vadd.f32 %v1296_v52, %v1280_v58 }
 0x258   : > { %v770_v53 = vpop.xlane.xlu2 %769  ;;  %v659_v55 = vpop.xlane.xlu1 %658 }
 0x259   : > { %vm790_vm15 = vcmp.eq.f32.partialorder %v2147_v16, %v770_v53  ;;  %vm678_vm1 = vcmp.eq.f32.partialorder %v2150_v17, %v659_v55 }
 0x25a   : > { %v1297_v61 = vsel %vm790_vm15, 1.0, %v1812_v54  ;;  %v1282_v56 = vsel %vm678_vm1, 1.0, %v1812_v54 }
 0x25b   : > { %v838_v0 = vadd.f32 %v1297_v61, %v1281_v60 }
 0x25d   : > { %v848_v1 = vpack.c.bf16 %v838_v0, %v837_v50 }
 0x25f   : > { %948 = vmatmul.bf16.vlgmr.msra.gmra.mxu2 %v848_v1 }
 0x260   : > { %v661_v7 = vpop.xlane.xlu2 %660  ;;  %v772_v59 = vpop.xlane.xlu1 %771 }
 0x261   : > { %vm791_vm0 = vcmp.eq.f32.partialorder %v2160_v30, %v772_v59  ;;  %vm679_vm2 = vcmp.eq.f32.partialorder %v2157_v29, %v661_v7 }
 0x262   : > { %v1298_v4 = vsel %vm791_vm0, 1.0, %v1812_v54  ;;  %v1283_v3 = vsel %vm679_vm2, 1.0, %v1812_v54 }
 0x263   : > { %v839_v9 = vadd.f32 %v1298_v4, %v1282_v56 }
 0x268   : > { %v774_v16 = vpop.xlane.xlu2 %773  ;;  %v663_v2 = vpop.xlane.xlu1 %662 }
 0x269   : > { %vm792_vm3 = vcmp.eq.f32.partialorder %v2167_v39, %v774_v16  ;;  %vm680_vm5 = vcmp.eq.f32.partialorder %v2170_v43, %v663_v2 }
 0x26a   : > { %v1299_v8 = vsel %vm792_vm3, 1.0, %v1812_v54  ;;  %v1284_v28 = vsel %vm680_vm5, 1.0, %v1812_v54 }
 0x26b   : > { %v840_v14 = vadd.f32 %v1299_v8, %v1283_v3 }
 0x26d   : > { %v849_v40 = vpack.c.bf16 %v840_v14, %v839_v9 }
 0x26f   : > { %953 = vmatmul.bf16.gmra.mxu2 %v849_v40 }
 0x270   : > { %v665_v30 = vpop.xlane.xlu2 %664  ;;  %v776_v17 = vpop.xlane.xlu1 %775 }
 0x271   : > { %vm793_vm4 = vcmp.eq.f32.partialorder %v2186_v49, %v776_v17  ;;  %vm681_vm6 = vcmp.eq.f32.partialorder %v2183_v62, %v665_v30 }
 0x272   : > { %v1300_v29 = vsel %vm793_vm4, 1.0, %v1812_v54  ;;  %v1285_v25 = vsel %vm681_vm6, 1.0, %v1812_v54 }
 0x273   : > { %v841_v46 = vadd.f32 %v1300_v29, %v1284_v28 }
 0x278   : > { %v778_v39 = vpop.xlane.xlu2 %777  ;;  %v647_v22 = vpop.xlane.xlu1 %646 }
 0x279   : > { %vm794_vm7 = vcmp.eq.f32.partialorder %v2199_v10, %v778_v39  ;;  %v760_v10 = vpop.xlane.xlu0 %759  ;;  %vm672_vm12 = vcmp.eq.f32.partialorder %v2203_v11, %v647_v22 }
 0x27a   : > { %v1301_v21 = vsel %vm794_vm7, 1.0, %v1812_v54  ;;  %vm785_vm13 = vcmp.eq.f32.partialorder %v2103_v27, %v760_v10  ;;  %v1276_v34 = vsel %vm672_vm12, 1.0, %v1812_v54 }
 0x27b   : > { %v842_v23 = vadd.f32 %v1301_v21, %v1285_v25  ;;  %v1292_v11 = vsel %vm785_vm13, 1.0, %v1812_v54 }
 0x27d   : > { %v850_v49 = vpack.c.bf16 %v842_v23, %v841_v46 }
 0x27e   : > { %v924_v24 = vpop.f32.mrf.mxu1 }
 0x27f   : > { %958 = vmatmul.bf16.gmra.mxu2 %v850_v49 }
 0x280   : > { %996 = vmatpush.bf16.msrb.mxu2 %v850_v49  ;;  %v766_v43 = vpop.xlane.xlu2 %765  ;;  %v762_v5 = vpop.xlane.xlu1 %761 }
 0x281   : > { %vm788_vm8 = vcmp.eq.f32.partialorder %v2209_v15, %v766_v43  ;;  %vm786_vm14 = vcmp.eq.f32.partialorder %v2212_v18, %v762_v5  ;;  %v833_v18 = vadd.f32 %v1292_v11, %v1276_v34 }
 0x282   : > { %v1295_v62 = vsel %vm788_vm8, 1.0, %v1812_v54  ;;  %v1293_v27 = vsel %vm786_vm14, 1.0, %v1812_v54 }
 0x283   : > { %v836_v15 = vadd.f32 %v1295_v62, %v1279_v31 }
 0x284   : > { %997 = vmatpush.bf16.msrb.mxu2 %v849_v40 }
 0x285   : > { %v847_v35 = vpack.c.bf16 %v836_v15, %v835_v47 }
 0x286   : > { %v926_v44 = vpop.f32.mrf.mxu1 }
 0x287   : > { %v1362_v32 = vpack.c.bf16 %v926_v44, %v924_v24 }
 0x288   : > { %998 = vmatpush.bf16.msrb.mxu2 %v848_v1  ;;  %v649_v12 = vpop.xlane.xlu2 %648 }
 0x289   : > { %1363 = vst [vmem:[%s2288_s23] sm:$0xff] %v1362_v32   ;;  %vm673_vm15 = vcmp.eq.f32.partialorder %v2222_v41, %v649_v12 }
 0x28a   : > { %v1277_v33 = vsel %vm673_vm15, 1.0, %v1812_v54  ;;  %v1813_v54 = vmov 1065369472  }
 0x28b   : > { %v834_v36 = vadd.f32 %v1293_v27, %v1277_v33 }
 0x28c   : > { %999 = vmatpush.bf16.msrb.mxu2 %v847_v35 }
 0x28d   : > { %v846_v37 = vpack.c.bf16 %v834_v36, %v833_v18 }
 0x28f   : > { %938 = vmatmul.bf16.gmra.mxu1 %v846_v37 }
 0x290   : > { %1000 = vmatpush.bf16.msrb.mxu2 %v846_v37 }
 0x294   : > { %1001 = vmatpush.bf16.msrb.mxu2 %v2239_v45 }
 0x296   : > { %v929_v38 = vpop.f32.mrf.mxu1 }
 0x298   : > { %1002 = vmatpush.bf16.msrb.mxu2 %v2228_v63 }
 0x29c   : > { %1003 = vmatpush.bf16.msrb.mxu2 %v2194_v57 }
 0x29e   : > { %v931_v41 = vpop.f32.mrf.mxu1 }
 0x29f   : > { %v1367_v13 = vpack.c.bf16 %v931_v41, %v929_v38  ;;  %943 = vmatmul.bf16.gmra.mxu1 %v847_v35  ;;  %1004 = vmatmul.bf16.vlgmr.msrb.gmra.mxu2 %v1813_v54 }
 0x2a1   : > { %1399 = vst [vmem:[%s2288_s23 + $0x8] sm:$0xff] %v1367_v13  }
 0x2a6   : > { %v934_v19 = vpop.f32.mrf.mxu1 }
 0x2ae   : > { %v936_v20 = vpop.f32.mrf.mxu1 }
 0x2af   : > { %v1372_v48 = vpack.c.bf16 %v936_v20, %v934_v19 }
 0x2b1   : > { %1400 = vst [vmem:[%s2288_s23 + $0x10] sm:$0xff] %v1372_v48  }
 0x2e2   : > { %v949_v45 = vpop.f32.mrf.mxu2 }
 0x2ea   : > { %v951_v26 = vpop.f32.mrf.mxu2 }
 0x2eb   : > { %v1387_v63 = vpack.c.bf16 %v951_v26, %v949_v45 }
 0x2ed   : > { %1403 = vst [vmem:[%s2288_s23 + $0x28] sm:$0xff] %v1387_v63  }
 0x2f2   : > { %v954_v57 = vpop.f32.mrf.mxu2 }
 0x2fa   : > { %v956_v51 = vpop.f32.mrf.mxu2 }
 0x2fb   : > { %v1392_v52 = vpack.c.bf16 %v956_v51, %v954_v57 }
 0x2fd   : > { %1404 = vst [vmem:[%s2288_s23 + $0x30] sm:$0xff] %v1392_v52  }
 0x302   : > { %v959_v53 = vpop.f32.mrf.mxu2 }
 0x30a   : > { %v961_v55 = vpop.f32.mrf.mxu2 }
 0x30b   : > { %v1397_v58 = vpack.c.bf16 %v961_v55, %v959_v53 }
 0x30c   : > { %v939_v60 = vpop.f32.mrf.mxu1 }
 0x30d   : > { %1405 = vst [vmem:[%s2288_s23 + $0x38] sm:$0xff] %v1397_v58  }
 0x314   : > { %v941_v61 = vpop.f32.mrf.mxu1 }
 0x315   : > { %v1377_v50 = vpack.c.bf16 %v941_v61, %v939_v60 }
 0x317   : > { %1401 = vst [vmem:[%s2288_s23 + $0x18] sm:$0xff] %v1377_v50  }
 0x31c   : > { %v944_v0 = vpop.f32.mrf.mxu1 }
 0x322   : > { %v1005_v1 = vpop.f32.mrf.mxu2 }
 0x323   : > { %1009 = vst [vmem:[%s407_s0] sm:$0xff] %v1005_v1 }
 0x324   : > { %v946_v7 = vpop.f32.mrf.mxu1 }
 0x325   : > { %1688 = shalt.err (!%p1685_p13)
}
 0x326   : > { %1435 = dma.vmem_to_hbm [thread:$0]  (%p1947_p5), %s1050_s24, 128, %s1052_s17, %s1016_s14   ;;  %v1382_v59 = vpack.c.bf16 %v946_v7, %v944_v0 }
 0x327   : > { %s1011_s21 = scalar_lea.sflag [#allocation4], %s1985_s27  ;;  %s1703_s12 = sshra.s32 %s2318_s2, 4  ;;  %s1704_s12 = int_to_ptr.hbm [resolvable:$true] %s1703_s12 }
 0x328   : > { %1402 = vst [vmem:[%s2288_s23 + $0x20] sm:$0xff] %v1382_v59   ;;  %s1705_s13 = scalar_lea.hbm %s1704_s12, 64  ;;  %s1709_s9 = scalar_lea.hbm %s2416_s11, 256 }
 0x329   : > { %p1706_p0 = scmp.ne.s32.totalorder %s1704_s12, %s1705_s13  ;;  %p1710_p9 = scmp.lt.s32.totalorder %s1704_s12, %s2416_s11 }
 0x32a   : > { %p1711_p2 = scmp.lt.s32.totalorder %s1709_s9, %s1705_s13 }
 0x32b   : > { %p1707_p3 = pnand %p1706_p0, %p1947_p5 }
 0x32c   : > { %p1712_p1 = por %p1711_p2, %p1710_p9 }
 0x32d   : > { %p1708_p7 = pneg %p1707_p3 }
 0x32f   : > { %p1713_p4 = pnand %p1712_p1, %p1708_p7 }
 0x331   : > { %1716 = shalt.err (!%p1713_p4)
}
 0x332   : > { %s1814_s27 = smov 64   ;;  %s1815_s23 = smov 4   ;;  %v1007_v4 = vpop.f32.mrf.mxu2 }
 0x333   : > { %1434 = dma.vmem_to_hbm [thread:$0]  (%p1947_p5), %s2316_s15, 1024, %s2318_s2, %s1011_s21, %s1814_s27, %s1814_s27, %s1815_s23  }
 0x334 PF: > { %s2418_s24 = sld [smem:[#allocation19_spill]]  ;;  %p1464_p8 = scmp.ge.s32.totalorder %s1803_s8, 2 }
 0x336   : > { %p1453_p10 = pnand %p1464_p8, %p1911_p6 }
 0x338   : > { %p1454_p11 = pneg %p1453_p10 }
 0x33a   : > { %s1063_s14 = sand.u32 1, %s2418_s24  }
 0x33b   : > { %s1064_s10 = scalar_lea.sflag [#allocation4], %s1063_s14 }
 0x33c   : > { %1766 = dma.done.wait (%p1454_p11), %s1064_s10, 1024  }
 0x33d   : > { %1768 = vsyncadd (%p1454_p11), %s1064_s10, 4294966272  ;;  %s1074_s6 = scalar_lea.sflag [#allocation12], %s1063_s14 }
 0x33e   : > { %1770 = dma.done.wait (%p1454_p11), %s1074_s6, 128  }
 0x33f   : > { %1772 = vsyncadd (%p1454_p11), %s1074_s6, 4294967168  ;;  %s31_s8 = sadd.s32 1, %s1803_s8   ;;  %s2420_s28 = sld [smem:[#allocation26_spill]] }
 0x340   : > { %p28_p12 = scmp.ge.s32.totalorder %s31_s8, 6   ;;  %s2421_s15 = sld [smem:[#allocation21_spill]] }
 0x341   : > { %s2422_s2 = sld [smem:[#allocation23_spill]]  ;;  %s2424_s24 = smov %s1779_s25 }
 0x342   : > { %s2423_s30 = sld [smem:[#allocation25_spill]]  ;;  %s2425_s25 = smov %s1783_s26 }
 0x343   : > { %s2427_s27 = smov %s1795_s29  ;;  %30 = sbr.rel (!%p28_p12) target bundleno = 18 (0x12), region = 127 }
 0x345   : > { %s2426_s26 = smov %s2420_s28 }
 0x346   : > { %s2428_s28 = smov %s2421_s15 }
 0x347   : > { %s2429_s29 = smov %s2422_s2 }
 0x348   :  { %1080 = vsyncpa [#allocation3], 1 }
 0x349   :  { %1082 = vsyncpa [#allocation3 + $0x1], 1 }
 0x34a   :  { %1083 = vsyncpa [#allocation6], 1 }
 0x34b   :  { %1085 = vsyncpa [#allocation6 + $0x1], 1 }
 0x34c   :  { %1086 = vsyncpa [#allocation9], 1 }
 0x34d   :  { %1087 = vsyncpa [#allocation4], 1 }
 0x34e   :  { %1089 = vsyncpa [#allocation4 + $0x1], 1 }
 0x34f   :  { %1090 = vsyncpa [#allocation12], 1 }
 0x350   :  { %1092 = vsyncpa [#allocation12 + $0x1], 1 }

</bundles_post_ra>
